<compile_context>
chip_gen: v7x
topology: tpu7x:2x2x1
jax: 0.10.0
libtpu: 0.0.40
codegen_flags: <defaults>
</compile_context>

<pallas_src>
import functools

import jax
import jax.numpy as jnp
from jax.experimental import pallas as pl
from jax.experimental.pallas import tpu as pltpu


# ----------------------------------------------------------------------------
# Shared epilogue: bias -> ReLU -> BatchNorm1d (batch stats) -> [L2 normalize]
# ----------------------------------------------------------------------------
def _fc_epilogue(acc, b, gamma, beta, *, bn_eps, normalize, l2_eps):
    y = jnp.maximum(acc + b, 0.0)
    inv_n = 1.0 / y.shape[0]                        # compile-time reciprocal
    mean = jnp.sum(y, axis=0, keepdims=True) * inv_n
    centered = y - mean
    var = jnp.sum(centered * centered, axis=0, keepdims=True) * inv_n
    out = centered * jax.lax.rsqrt(var + bn_eps) * gamma + beta
    if normalize:
        # F.normalize(p=2): y / max(||y||, eps) == y * rsqrt(max(sum_sq, eps^2))
        sum_sq = jnp.sum(out * out, axis=-1, keepdims=True)
        out = out * jax.lax.rsqrt(jnp.maximum(sum_sq, l2_eps * l2_eps))
    return out


def _pick_k_tile(d_in, max_tile=512):
    if d_in <= max_tile:
        return d_in
    for t in (max_tile, 256, 128):
        if d_in % t == 0:
            return t
    return d_in


# ----------------------------------------------------------------------------
# Fused FullyConnected: Linear -> ReLU -> BatchNorm1d (batch stats) -> [L2 norm]
# The f32 output block (constant index across K) doubles as the accumulator.
# ----------------------------------------------------------------------------
def _fc_fused_kernel(x_ref, w_ref, b_ref, gamma_ref, beta_ref, o_ref,
                     *, bn_eps, normalize, l2_eps):
    k = pl.program_id(0)

    @pl.when(k == 0)
    def _():
        o_ref[...] = jnp.zeros_like(o_ref)

    o_ref[...] += jnp.dot(x_ref[...], w_ref[...],
                          preferred_element_type=jnp.float32)

    @pl.when(k == pl.num_programs(0) - 1)
    def _():
        o_ref[...] = _fc_epilogue(o_ref[...], b_ref[...], gamma_ref[...],
                                  beta_ref[...], bn_eps=bn_eps,
                                  normalize=normalize, l2_eps=l2_eps)


def fully_connected(x, w, b, gamma, beta, *, normalize=False, bn_eps=1e-3):
    """x: (B, n, D_in) f32; w: (D_in, D_out); returns (B, n, D_out) f32."""
    B, n, D_in = x.shape
    D_out = w.shape[1]
    N = B * n
    xf = x.reshape(N, D_in)

    tk = _pick_k_tile(D_in)
    kt = D_in // tk
    # TODO(synk): for very large B*n (row block no longer VMEM-resident, esp. v7x 64MiB),
    # switch to a row-tiled two-pass BN (accumulate sum / sum-of-squares, then normalize).

    kern = functools.partial(_fc_fused_kernel, bn_eps=bn_eps,
                             normalize=normalize, l2_eps=1e-12)
    out = pl.pallas_call(
        kern,
        out_shape=jax.ShapeDtypeStruct((N, D_out), jnp.float32),
        grid_spec=pltpu.PrefetchScalarGridSpec(
            num_scalar_prefetch=0,
            grid=(kt,),  # reduction over D_in; rows + output stay resident
            in_specs=[
                pl.BlockSpec((N, tk), lambda k: (0, k)),
                pl.BlockSpec((tk, D_out), lambda k: (k, 0)),
                pl.BlockSpec((1, D_out), lambda k: (0, 0)),
                pl.BlockSpec((1, D_out), lambda k: (0, 0)),
                pl.BlockSpec((1, D_out), lambda k: (0, 0)),
            ],
            out_specs=pl.BlockSpec((N, D_out), lambda k: (0, 0)),
        ),
        compiler_params=pltpu.CompilerParams(
            dimension_semantics=("arbitrary",)),
    )(xf, w, b.reshape(1, D_out), gamma.reshape(1, D_out), beta.reshape(1, D_out))
    return out.reshape(B, n, D_out)


# ----------------------------------------------------------------------------
# Fused K+V FullyConnected: both heads share the same input x_context, so one
# pallas_call streams x_context once and produces both L2-normalized outputs.
# ----------------------------------------------------------------------------
def _fc_kv_kernel(x_ref, wk_ref, wv_ref, bk_ref, bv_ref, gk_ref, gv_ref,
                  betak_ref, betav_ref, ko_ref, vo_ref, *, bn_eps, l2_eps):
    step = pl.program_id(0)

    @pl.when(step == 0)
    def _():
        ko_ref[...] = jnp.zeros_like(ko_ref)
        vo_ref[...] = jnp.zeros_like(vo_ref)

    xb = x_ref[...]                    # loaded once, feeds both matmuls
    ko_ref[...] += jnp.dot(xb, wk_ref[...], preferred_element_type=jnp.float32)
    vo_ref[...] += jnp.dot(xb, wv_ref[...], preferred_element_type=jnp.float32)

    @pl.when(step == pl.num_programs(0) - 1)
    def _():
        ko_ref[...] = _fc_epilogue(ko_ref[...], bk_ref[...], gk_ref[...],
                                   betak_ref[...], bn_eps=bn_eps,
                                   normalize=True, l2_eps=l2_eps)
        vo_ref[...] = _fc_epilogue(vo_ref[...], bv_ref[...], gv_ref[...],
                                   betav_ref[...], bn_eps=bn_eps,
                                   normalize=True, l2_eps=l2_eps)


def fully_connected_kv(x, params_k, params_v, *, bn_eps=1e-3):
    """x: (B, m, D_in); returns (k, v) with shapes (B, m, d1), (B, m, d2)."""
    wk, bk, gk, betak = params_k
    wv, bv, gv, betav = params_v
    B, m, D_in = x.shape
    d1 = wk.shape[1]
    d2 = wv.shape[1]
    N = B * m
    xf = x.reshape(N, D_in)

    tk = _pick_k_tile(D_in)
    kt = D_in // tk

    kern = functools.partial(_fc_kv_kernel, bn_eps=bn_eps, l2_eps=1e-12)
    k_out, v_out = pl.pallas_call(
        kern,
        out_shape=(jax.ShapeDtypeStruct((N, d1), jnp.float32),
                   jax.ShapeDtypeStruct((N, d2), jnp.float32)),
        grid_spec=pltpu.PrefetchScalarGridSpec(
            num_scalar_prefetch=0,
            grid=(kt,),
            in_specs=[
                pl.BlockSpec((N, tk), lambda k: (0, k)),
                pl.BlockSpec((tk, d1), lambda k: (k, 0)),
                pl.BlockSpec((tk, d2), lambda k: (k, 0)),
                pl.BlockSpec((1, d1), lambda k: (0, 0)),
                pl.BlockSpec((1, d2), lambda k: (0, 0)),
                pl.BlockSpec((1, d1), lambda k: (0, 0)),
                pl.BlockSpec((1, d2), lambda k: (0, 0)),
                pl.BlockSpec((1, d1), lambda k: (0, 0)),
                pl.BlockSpec((1, d2), lambda k: (0, 0)),
            ],
            out_specs=(pl.BlockSpec((N, d1), lambda k: (0, 0)),
                       pl.BlockSpec((N, d2), lambda k: (0, 0))),
        ),
        compiler_params=pltpu.CompilerParams(
            dimension_semantics=("arbitrary",)),
    )(xf, wk, wv,
      bk.reshape(1, d1), bv.reshape(1, d2),
      gk.reshape(1, d1), gv.reshape(1, d2),
      betak.reshape(1, d1), betav.reshape(1, d2))
    return k_out.reshape(B, m, d1), v_out.reshape(B, m, d2)


# ----------------------------------------------------------------------------
# Attention core: weights = q@k^T, valid-length masking, softmax(w/temp), p@v
# ----------------------------------------------------------------------------
def _attention_core_kernel(nvalid_ref, q_ref, k_ref, v_ref, o_ref, *, inv_temp):
    b = pl.program_id(0)
    n_valid = nvalid_ref[b]

    q = q_ref[...]     # (n, d1)
    kk = k_ref[...]    # (m, d1)
    v = v_ref[...]     # (m, d2)

    # q @ k^T without materializing a transpose.
    w = jax.lax.dot_general(q, kk, dimension_numbers=(((1,), (1,)), ((), ())),
                            preferred_element_type=jnp.float32)      # (n, m)

    col = jax.lax.broadcasted_iota(jnp.int32, w.shape, 1)
    w = jnp.where(col < n_valid, w, -1e9)   # masked_fill happens BEFORE /temp (as in torch)

    s = w * inv_temp
    s_max = jnp.max(s, axis=-1, keepdims=True)
    p = jnp.exp(s - s_max)
    p = p / jnp.sum(p, axis=-1, keepdims=True)

    # Masking v matters when n_valid == 0 (softmax is then uniform over masked cols).
    row = jax.lax.broadcasted_iota(jnp.int32, v.shape, 0)
    v_masked = jnp.where(row < n_valid, v, 0.0)

    o_ref[...] = jnp.dot(p, v_masked,
                         preferred_element_type=jnp.float32).astype(o_ref.dtype)


def attention_core(q, k, v, num_valid, *, temp):
    B, n, d1 = q.shape
    m = k.shape[1]
    d2 = v.shape[2]
    num_valid = num_valid.reshape(-1).astype(jnp.int32)   # accepts (B,) or (B, 1)

    kern = functools.partial(_attention_core_kernel, inv_temp=float(1.0 / temp))
    return pl.pallas_call(
        kern,
        out_shape=jax.ShapeDtypeStruct((B, n, d2), jnp.float32),
        grid_spec=pltpu.PrefetchScalarGridSpec(
            num_scalar_prefetch=1,              # num_valid -> SMEM
            grid=(B,),
            in_specs=[
                pl.BlockSpec((None, n, d1), lambda b, nv: (b, 0, 0)),
                pl.BlockSpec((None, m, d1), lambda b, nv: (b, 0, 0)),
                pl.BlockSpec((None, m, d2), lambda b, nv: (b, 0, 0)),
            ],
            out_specs=pl.BlockSpec((None, n, d2), lambda b, nv: (b, 0, 0)),
        ),
        compiler_params=pltpu.CompilerParams(
            dimension_semantics=("parallel",)),
    )(num_valid, q, k, v)


# ----------------------------------------------------------------------------
# Full Attention forward
# ----------------------------------------------------------------------------
def attention_forward(x, x_context, num_valid_context_items, params, *, temp=0.01):
    """x: (B, n, F_in); x_context: (B, m, F_ctx); num_valid: (B,) or (B, 1) int."""
    # TODO(synk): self._last_weights / self._last_bias attribute caching is a stateful
    # side effect with no functional output and is not reproduced.
    q = fully_connected(x, *params["fc_q"], normalize=True)
    k, v = fully_connected_kv(x_context, params["fc_k"], params["fc_v"])
    wv = attention_core(q, k, v, num_valid_context_items, temp=temp)
    return fully_connected(wv, *params["fc_f"], normalize=False)


# ----------------------------------------------------------------------------
# Pure-JAX reference (mirrors the PyTorch module semantics)
# ----------------------------------------------------------------------------
def _fc_ref(x, w, b, gamma, beta, normalize, bn_eps=1e-3):
    B, n, D_in = x.shape
    xf = x.reshape(-1, D_in)
    y = jnp.maximum(jnp.dot(xf, w, precision=jax.lax.Precision.HIGHEST) + b, 0.0)
    mean = jnp.mean(y, axis=0, keepdims=True)
    var = jnp.mean((y - mean) ** 2, axis=0, keepdims=True)
    y = (y - mean) / jnp.sqrt(var + bn_eps) * gamma + beta
    y = y.reshape(B, n, -1)
    if normalize:
        nrm = jnp.sqrt(jnp.sum(y * y, axis=-1, keepdims=True))
        y = y / jnp.maximum(nrm, 1e-12)
    return y


def _attention_ref(x, x_context, num_valid, params, temp):
    q = _fc_ref(x, *params["fc_q"], normalize=True)
    k = _fc_ref(x_context, *params["fc_k"], normalize=True)
    v = _fc_ref(x_context, *params["fc_v"], normalize=True)
    w = jnp.einsum("bnd,bmd->bnm", q, k, precision=jax.lax.Precision.HIGHEST)
    m = w.shape[-1]
    valid = num_valid.reshape(-1)[:, None, None]
    w = jnp.where(jnp.arange(m)[None, None, :] < valid, w, -1e9)
    p = jax.nn.softmax(w / temp, axis=-1)
    v = jnp.where(jnp.arange(m)[None, :, None] < valid, v, 0.0)
    wv = jnp.einsum("bnm,bmd->bnd", p, v, precision=jax.lax.Precision.HIGHEST)
    return _fc_ref(wv, *params["fc_f"], normalize=False)


if __name__ == "__main__":
    B, n, m = 2, 8, 16
    num_input_feats = 128      # feature dims kept multiples of 128 -> lane-dense outputs
    num_context_feats = 128
    d1 = d2 = 128
    temp = 0.01

    key = jax.random.PRNGKey(0)
    ks = jax.random.split(key, 18)

    def init_fc(k0, k1, k2, k3, d_in, d_out):
        bound = 1.0 / (d_in ** 0.5)
        w = jax.random.uniform(k0, (d_in, d_out), minval=-bound, maxval=bound,
                               dtype=jnp.float32)
        b = jax.random.uniform(k1, (d_out,), minval=-bound, maxval=bound,
                               dtype=jnp.float32)
        gamma = 1.0 + 0.1 * jax.random.normal(k2, (d_out,), dtype=jnp.float32)
        beta = 0.1 * jax.random.normal(k3, (d_out,), dtype=jnp.float32)
        return w, b, gamma, beta

    params = {
        "fc_q": init_fc(ks[0], ks[1], ks[2], ks[3], num_input_feats, d1),
        "fc_k": init_fc(ks[4], ks[5], ks[6], ks[7], num_context_feats, d1),
        "fc_v": init_fc(ks[8], ks[9], ks[10], ks[11], num_context_feats, d2),
        "fc_f": init_fc(ks[12], ks[13], ks[14], ks[15], d2, num_input_feats),
    }

    x = jax.random.normal(ks[16], (B, n, num_input_feats), dtype=jnp.float32)
    x_context = jax.random.normal(ks[17], (B, m, num_context_feats), dtype=jnp.float32)
    num_valid = jnp.array([m, m // 2], dtype=jnp.int32)   # second image: half the context

    # Tight check of the fused FC and fused K+V kernels vs pure-JAX references.
    q_kernel = jax.block_until_ready(
        fully_connected(x, *params["fc_q"], normalize=True))
    q_ref = _fc_ref(x, *params["fc_q"], normalize=True)
    assert q_kernel.shape == (B, n, d1)
    assert jnp.allclose(q_kernel, q_ref, atol=2e-5, rtol=2e-5), "FC kernel mismatch"

    k_kernel, v_kernel = fully_connected_kv(x_context, params["fc_k"], params["fc_v"])
    jax.block_until_ready((k_kernel, v_kernel))
    k_ref = _fc_ref(x_context, *params["fc_k"], normalize=True)
    v_ref = _fc_ref(x_context, *params["fc_v"], normalize=True)
    assert jnp.allclose(k_kernel, k_ref, atol=2e-5, rtol=2e-5), "KV kernel (k) mismatch"
    assert jnp.allclose(v_kernel, v_ref, atol=2e-5, rtol=2e-5), "KV kernel (v) mismatch"

    # End-to-end Attention forward. (Looser tolerance: the paper's softmax temperature
    # of 0.01 amplifies f32 rounding differences between the MXU and XLA matmul paths.)
    out = jax.block_until_ready(
        attention_forward(x, x_context, num_valid, params, temp=temp))
    ref = _attention_ref(x, x_context, num_valid, params, temp)
    assert out.shape == (B, n, num_input_feats)
    assert jnp.allclose(out, ref, atol=1e-2, rtol=1e-2), "Attention forward mismatch"

    print("KERNEL_OK")
</pallas_src>

<mosaic_0001>
module attributes {stable_mosaic.version = 11 : i64} {
  func.func @_fc_fused_kernel(%arg0: i32, %arg1: memref<16x128xf32, #tpu.memory_space<vmem>>, %arg2: memref<128x128xf32, #tpu.memory_space<vmem>>, %arg3: memref<1x128xf32, #tpu.memory_space<vmem>>, %arg4: memref<1x128xf32, #tpu.memory_space<vmem>>, %arg5: memref<1x128xf32, #tpu.memory_space<vmem>>, %arg6: memref<16x128xf32, #tpu.memory_space<vmem>>) attributes {dimension_semantics = [#tpu.dimension_semantics<arbitrary>], iteration_bounds = array<i64: 1>, scalar_prefetch = 0 : i64, scratch_operands = 0 : i64, tpu.core_type = #tpu.core_type<tc>, window_params = [{transform_indices = @transform_0, window_bounds = array<i64: 16, 128>}, {transform_indices = @transform_1, window_bounds = array<i64: 128, 128>}, {pipeline_mode = #tpu.pipeline_mode<synchronous>, transform_indices = @transform_2, window_bounds = array<i64: 1, 128>}, {pipeline_mode = #tpu.pipeline_mode<synchronous>, transform_indices = @transform_3, window_bounds = array<i64: 1, 128>}, {pipeline_mode = #tpu.pipeline_mode<synchronous>, transform_indices = @transform_4, window_bounds = array<i64: 1, 128>}, {pipeline_mode = #tpu.pipeline_mode<synchronous>, transform_indices = @transform_5, window_bounds = array<i64: 16, 128>}]} {
    %c0_i32 = arith.constant 0 : i32
    %0 = arith.cmpi eq, %arg0, %c0_i32 : i32
    %1 = arith.extui %0 : i1 to i32
    %c0_i32_0 = arith.constant 0 : i32
    %2 = arith.cmpi ne, %1, %c0_i32_0 : i32
    scf.if %2 {
      %cst_10 = arith.constant 0.000000e+00 : f32
      %12 = vector.broadcast %cst_10 : f32 to vector<16x128xf32>
      %c0_11 = arith.constant 0 : index
      %c0_12 = arith.constant 0 : index
      %13 = vector.load %arg6[%c0_11, %c0_12] : memref<16x128xf32, #tpu.memory_space<vmem>>, vector<16x128xf32>
      tpu.vector_store %arg6[%c0_11, %c0_12], %12 {strides = array<i32>} : memref<16x128xf32, #tpu.memory_space<vmem>>, vector<16x128xf32>,
    } else {
    }
    %c0 = arith.constant 0 : index
    %c0_1 = arith.constant 0 : index
    %3 = vector.load %arg6[%c0, %c0_1] : memref<16x128xf32, #tpu.memory_space<vmem>>, vector<16x128xf32>
    %c0_2 = arith.constant 0 : index
    %c0_3 = arith.constant 0 : index
    %4 = vector.load %arg1[%c0_2, %c0_3] : memref<16x128xf32, #tpu.memory_space<vmem>>, vector<16x128xf32>
    %c0_4 = arith.constant 0 : index
    %c0_5 = arith.constant 0 : index
    %5 = vector.load %arg2[%c0_4, %c0_5] : memref<128x128xf32, #tpu.memory_space<vmem>>, vector<128x128xf32>
    %cst = arith.constant dense<0.000000e+00> : vector<16x128xf32>
    %6 = tpu.matmul %4, %5, %cst {dimension_numbers = #tpu.dot_dimension_numbers<[1], [0], [0], [1], [0, 0, 1, 1], [], []>} : vector<16x128xf32>, vector<128x128xf32>, vector<16x128xf32> -> vector<16x128xf32>
    %7 = arith.addf %3, %6 : vector<16x128xf32>
    %c0_6 = arith.constant 0 : index
    %c0_7 = arith.constant 0 : index
    %8 = vector.load %arg6[%c0_6, %c0_7] : memref<16x128xf32, #tpu.memory_space<vmem>>, vector<16x128xf32>
    tpu.vector_store %arg6[%c0_6, %c0_7], %7 {strides = array<i32>} : memref<16x128xf32, #tpu.memory_space<vmem>>, vector<16x128xf32>,
    %c0_i32_8 = arith.constant 0 : i32
    %9 = arith.cmpi eq, %arg0, %c0_i32_8 : i32
    %10 = arith.extui %9 : i1 to i32
    %c0_i32_9 = arith.constant 0 : i32
    %11 = arith.cmpi ne, %10, %c0_i32_9 : i32
    scf.if %11 {
      %c0_10 = arith.constant 0 : index
      %c0_11 = arith.constant 0 : index
      %12 = vector.load %arg6[%c0_10, %c0_11] : memref<16x128xf32, #tpu.memory_space<vmem>>, vector<16x128xf32>
      %c0_12 = arith.constant 0 : index
      %c0_13 = arith.constant 0 : index
      %13 = vector.load %arg3[%c0_12, %c0_13] : memref<1x128xf32, #tpu.memory_space<vmem>>, vector<1x128xf32>
      %c0_14 = arith.constant 0 : index
      %c0_15 = arith.constant 0 : index
      %14 = vector.load %arg4[%c0_14, %c0_15] : memref<1x128xf32, #tpu.memory_space<vmem>>, vector<1x128xf32>
      %c0_16 = arith.constant 0 : index
      %c0_17 = arith.constant 0 : index
      %15 = vector.load %arg5[%c0_16, %c0_17] : memref<1x128xf32, #tpu.memory_space<vmem>>, vector<1x128xf32>
      %16 = vector.broadcast %13 : vector<1x128xf32> to vector<16x128xf32>
      %17 = arith.addf %12, %16 : vector<16x128xf32>
      %cst_18 = arith.constant 0.000000e+00 : f32
      %18 = vector.broadcast %cst_18 : f32 to vector<16x128xf32>
      %19 = arith.maximumf %17, %18 : vector<16x128xf32>
      %cst_19 = arith.constant dense<0.000000e+00> : vector<128xf32>
      %20 = vector.multi_reduction <add>, %19, %cst_19 [0] : vector<16x128xf32> to vector<128xf32>
      %21 = vector.shape_cast %20 : vector<128xf32> to vector<1x128xf32>
      %cst_20 = arith.constant 6.250000e-02 : f32
      %22 = vector.broadcast %cst_20 : f32 to vector<1x128xf32>
      %23 = arith.mulf %21, %22 : vector<1x128xf32>
      %24 = vector.broadcast %23 : vector<1x128xf32> to vector<16x128xf32>
      %25 = arith.subf %19, %24 : vector<16x128xf32>
      %26 = arith.mulf %25, %25 : vector<16x128xf32>
      %cst_21 = arith.constant dense<0.000000e+00> : vector<128xf32>
      %27 = vector.multi_reduction <add>, %26, %cst_21 [0] : vector<16x128xf32> to vector<128xf32>
      %28 = vector.shape_cast %27 : vector<128xf32> to vector<1x128xf32>
      %cst_22 = arith.constant 6.250000e-02 : f32
      %29 = vector.broadcast %cst_22 : f32 to vector<1x128xf32>
      %30 = arith.mulf %28, %29 : vector<1x128xf32>
      %cst_23 = arith.constant 1.000000e-03 : f32
      %31 = vector.broadcast %cst_23 : f32 to vector<1x128xf32>
      %32 = arith.addf %30, %31 : vector<1x128xf32>
      %33 = math.rsqrt %32 : vector<1x128xf32>
      %34 = vector.broadcast %33 : vector<1x128xf32> to vector<16x128xf32>
      %35 = arith.mulf %25, %34 : vector<16x128xf32>
      %36 = vector.broadcast %14 : vector<1x128xf32> to vector<16x128xf32>
      %37 = arith.mulf %35, %36 : vector<16x128xf32>
      %38 = vector.broadcast %15 : vector<1x128xf32> to vector<16x128xf32>
      %39 = arith.addf %37, %38 : vector<16x128xf32>
      %40 = arith.mulf %39, %39 : vector<16x128xf32>
      %cst_24 = arith.constant dense<0.000000e+00> : vector<16xf32>
      %41 = vector.multi_reduction <add>, %40, %cst_24 [1] : vector<16x128xf32> to vector<16xf32>
      %42 = vector.shape_cast %41 : vector<16xf32> to vector<16x1xf32>
      %cst_25 = arith.constant 1.000000e-24 : f32
      %43 = vector.broadcast %cst_25 : f32 to vector<16x1xf32>
      %44 = arith.maximumf %42, %43 : vector<16x1xf32>
      %45 = math.rsqrt %44 : vector<16x1xf32>
      %46 = vector.broadcast %45 : vector<16x1xf32> to vector<16x128xf32>
      %47 = arith.mulf %39, %46 : vector<16x128xf32>
      %c0_26 = arith.constant 0 : index
      %c0_27 = arith.constant 0 : index
      %48 = vector.load %arg6[%c0_26, %c0_27] : memref<16x128xf32, #tpu.memory_space<vmem>>, vector<16x128xf32>
      tpu.vector_store %arg6[%c0_26, %c0_27], %47 {strides = array<i32>} : memref<16x128xf32, #tpu.memory_space<vmem>>, vector<16x128xf32>,
    } else {
    }
    return
  }
  func.func @transform_0(%arg0: i32) -> (i32, i32) {
    %c0_i32 = arith.constant 0 : i32
    %c0_i32_0 = arith.constant 0 : i32
    return %c0_i32, %arg0 : i32, i32
  }
  func.func @transform_1(%arg0: i32) -> (i32, i32) {
    %c0_i32 = arith.constant 0 : i32
    %c0_i32_0 = arith.constant 0 : i32
    return %arg0, %c0_i32 : i32, i32
  }
  func.func @transform_2(%arg0: i32) -> (i32, i32) {
    %c0_i32 = arith.constant 0 : i32
    %c0_i32_0 = arith.constant 0 : i32
    %c0_i32_1 = arith.constant 0 : i32
    return %c0_i32, %c0_i32_0 : i32, i32
  }
  func.func @transform_3(%arg0: i32) -> (i32, i32) {
    %c0_i32 = arith.constant 0 : i32
    %c0_i32_0 = arith.constant 0 : i32
    %c0_i32_1 = arith.constant 0 : i32
    return %c0_i32, %c0_i32_0 : i32, i32
  }
  func.func @transform_4(%arg0: i32) -> (i32, i32) {
    %c0_i32 = arith.constant 0 : i32
    %c0_i32_0 = arith.constant 0 : i32
    %c0_i32_1 = arith.constant 0 : i32
    return %c0_i32, %c0_i32_0 : i32, i32
  }
  func.func @transform_5(%arg0: i32) -> (i32, i32) {
    %c0_i32 = arith.constant 0 : i32
    %c0_i32_0 = arith.constant 0 : i32
    %c0_i32_1 = arith.constant 0 : i32
    return %c0_i32, %c0_i32_0 : i32, i32
  }
}

</mosaic_0001>

<bundles_post_ra>
// kernel: tpu_custom_call.1
= control target key start
LH: loop header
LB: loop body
LE: loop exit
PB: predicated region body
PF: predicated region fallthrough
CT: control target
= control target key end

     0   :  { %10 = vsyncpa [#allocation3], 0  ;;  %s505_s0 = inlined_call_operand.hbm [shape: f32[16,128], index: 0, kind: input, shape index: {}]   ;;  %s506_s1 = inlined_call_operand.hbm [shape: f32[128,128], index: 1, kind: input, shape index: {}]   ;;  %s507_s2 = inlined_call_operand.vmem [shape: f32[1,128], index: 2, kind: input, shape index: {}]   ;;  %s508_s3 = inlined_call_operand.vmem [shape: f32[1,128], index: 3, kind: input, shape index: {}]   ;;  %s509_s4 = inlined_call_operand.vmem [shape: f32[1,128], index: 4, kind: input, shape index: {}]   ;;  %s510_s5 = inlined_call_operand.hbm [shape: f32[16,128], index: 5, kind: output, shape index: {}]  }
   0x1   :  { %11 = vsyncpa [#allocation6], 0 }
   0x2   :  { %12 = vsyncpa [#allocation4], 0  ;;  %s416_s18 = smov [#allocation2]   ;;  %s344_s22 = scalar_lea.hbm %s505_s0, 256 }
   0x3   :  { %s18_s19 = sshll.u32 %s416_s18, 4  ;;  %p345_p0 = scmp.ne.s32.totalorder %s505_s0, %s344_s22  ;;  %s19_s19 = int_to_ptr.vmem [resolvable:$true] %s18_s19 }
   0x4   :  { %p348_p1 = scmp.lt.u32.totalorder %s344_s22, %s505_s0 }
   0x6   :  { %p350_p2 = pnand %p348_p1, %p345_p0 }
   0x8   :  { %353 = shalt.err (!%p350_p2)
}
   0x9   :  { %s354_s27 = scalar_lea.vmem %s19_s19, 256  ;;  %p359_p4 = scmp.lt.s32.totalorder %s19_s19, %s19_s19 }
   0xa   :  { %p355_p3 = scmp.ne.s32.totalorder %s19_s19, %s354_s27  ;;  %p360_p5 = scmp.lt.s32.totalorder %s354_s27, %s354_s27 }
   0xc   :  { %p361_p6 = por %p360_p5, %p359_p4 }
   0xe   :  { %p362_p7 = pnand %p361_p6, %p355_p3 }
  0x10   :  { %365 = shalt.err (!%p362_p7)
}
  0x11   :  { %s417_s28 = smov 128   ;;  %s418_s29 = smov 8  }
  0x12   :  { %24 = dma.hbm_to_vmem [thread:$0]  %s505_s0, 256, %s19_s19, [#allocation3], %s417_s28, %s417_s28, %s418_s29  }
  0x13   :  { %s419_s7 = smov [#allocation5]   ;;  %s366_s11 = scalar_lea.hbm %s506_s1, 2048 }
  0x14   :  { %s30_s8 = sshll.u32 %s419_s7, 4  ;;  %p367_p8 = scmp.ne.s32.totalorder %s506_s1, %s366_s11  ;;  %s31_s8 = int_to_ptr.vmem [resolvable:$true] %s30_s8 }
  0x15   :  { %p370_p9 = scmp.lt.u32.totalorder %s366_s11, %s506_s1 }
  0x17   :  { %p372_p10 = pnand %p370_p9, %p367_p8 }
  0x19   :  { %375 = shalt.err (!%p372_p10)
}
  0x1a   :  { %s376_s16 = scalar_lea.vmem %s31_s8, 2048  ;;  %p381_p12 = scmp.lt.s32.totalorder %s31_s8, %s31_s8 }
  0x1b   :  { %p377_p11 = scmp.ne.s32.totalorder %s31_s8, %s376_s16  ;;  %p382_p13 = scmp.lt.s32.totalorder %s376_s16, %s376_s16 }
  0x1d   :  { %p383_p0 = por %p382_p13, %p381_p12 }
  0x1f   :  { %p384_p1 = pnand %p383_p0, %p377_p11 }
  0x21   :  { %387 = shalt.err (!%p384_p1)
}
  0x22   :  { %36 = dma.hbm_to_vmem [thread:$0]  %s506_s1, 2048, %s31_s8, [#allocation6], %s417_s28, %s417_s28, %s418_s29  }
  0x23   :  { %410 = dma.done.wait [#allocation3], 256  }
  0x24   :  { %411 = vsyncadd [#allocation3], 4294967040 }
  0x25   :  { %412 = dma.done.wait [#allocation6], 2048  }
  0x26   :  { %413 = vsyncadd [#allocation6], 4294965248  ;;  %v59_v0 = vld [vmem:[#allocation5] sm:$0xff]  ;;  %v60_v1 = vld [vmem:[#allocation5 + $0x8] sm:$0xff] }
  0x27   :  { %v61_v2 = vld [vmem:[#allocation5 + $0x10] sm:$0xff]  ;;  %v300_v3 = vpack.c.bf16 %v60_v1, %v59_v0  ;;  %v62_v4 = vld [vmem:[#allocation5 + $0x18] sm:$0xff]  ;;  %v63_v6 = vld [vmem:[#allocation5 + $0x20] sm:$0xff] }
  0x28   :  { %v304_v5 = vpack.c.bf16 %v62_v4, %v61_v2  ;;  %v64_v7 = vld [vmem:[#allocation5 + $0x28] sm:$0xff]  ;;  %v57_v9 = vld [vmem:[#allocation2] sm:$0xff]  ;;  %v66_v11 = vld [vmem:[#allocation5 + $0x38] sm:$0xff] }
  0x29   :  { %301 = vmatprep.subr.bf16.mxu0 %v300_v3  ;;  %v308_v8 = vpack.c.bf16 %v64_v7, %v63_v6  ;;  %v65_v10 = vld [vmem:[#allocation5 + $0x30] sm:$0xff]  ;;  %297 = vmatprep.mubr.f32.mxu0 %v57_v9  ;;  %v67_v13 = vld [vmem:[#allocation5 + $0x40] sm:$0xff]  ;;  %v68_v14 = vld [vmem:[#allocation5 + $0x48] sm:$0xff] }
  0x2a   :  { %303 = vmatpush3.bf16.msra.mxu0 %v300_v3  ;;  %v312_v12 = vpack.c.bf16 %v66_v11, %v65_v10  ;;  %v316_v15 = vpack.c.bf16 %v68_v14, %v67_v13  ;;  %v69_v16 = vld [vmem:[#allocation5 + $0x50] sm:$0xff]  ;;  %v70_v17 = vld [vmem:[#allocation5 + $0x58] sm:$0xff]  ;;  %v71_v19 = vld [vmem:[#allocation5 + $0x60] sm:$0xff] }
  0x2b   :  { %305 = vmatprep.subr.bf16.mxu0 %v304_v5  ;;  %v320_v18 = vpack.c.bf16 %v70_v17, %v69_v16  ;;  %v72_v20 = vld [vmem:[#allocation5 + $0x68] sm:$0xff]  ;;  %v73_v22 = vld [vmem:[#allocation5 + $0x70] sm:$0xff]  ;;  %v74_v23 = vld [vmem:[#allocation5 + $0x78] sm:$0xff] }
  0x2c   :  { %v324_v21 = vpack.c.bf16 %v72_v20, %v71_v19  ;;  %v328_v24 = vpack.c.bf16 %v74_v23, %v73_v22  ;;  %v58_v25 = vld [vmem:[#allocation2 + $0x8] sm:$0xff]  ;;  %v244_v27 = vld [vmem:[%s507_s2] ss:$0 sm:$0xff] }
  0x2d   :  { %v245_v55 = vld [vmem:[%s508_s3] ss:$0 sm:$0xff]  ;;  %s420_s3 = smov [#allocation7]  }
  0x2e   :  { %307 = vmatpush3.bf16.msra.mxu0 %v304_v5  ;;  %v246_v58 = vld [vmem:[%s509_s4] ss:$0 sm:$0xff]  ;;  %s231_s22 = sshll.u32 %s420_s3, 4  ;;  %s232_s22 = int_to_ptr.vmem [resolvable:$true] %s231_s22 }
  0x2f   :  { %309 = vmatprep.subr.bf16.mxu0 %v308_v8  ;;  %s388_s4 = scalar_lea.vmem %s232_s22, 256  ;;  %p393_p3 = scmp.lt.s32.totalorder %s232_s22, %s232_s22 }
  0x30   :  { %p389_p2 = scmp.ne.s32.totalorder %s232_s22, %s388_s4  ;;  %p394_p4 = scmp.lt.s32.totalorder %s388_s4, %s388_s4 }
  0x32   :  { %311 = vmatpush3.bf16.msra.mxu0 %v308_v8  ;;  %p395_p5 = por %p394_p4, %p393_p3 }
  0x33   :  { %313 = vmatprep.subr.bf16.mxu0 %v312_v12 }
  0x34   :  { %p396_p6 = pnand %p395_p5, %p389_p2 }
  0x36   :  { %315 = vmatpush3.bf16.msra.mxu0 %v312_v12 }
  0x37   :  { %317 = vmatprep.subr.bf16.mxu0 %v316_v15 }
  0x3a   :  { %319 = vmatpush3.bf16.msra.mxu0 %v316_v15 }
  0x3b   :  { %321 = vmatprep.subr.bf16.mxu0 %v320_v18 }
  0x3e   :  { %323 = vmatpush3.bf16.msra.mxu0 %v320_v18 }
  0x3f   :  { %325 = vmatprep.subr.bf16.mxu0 %v324_v21 }
  0x42   :  { %327 = vmatpush3.bf16.msra.mxu0 %v324_v21 }
  0x43   :  { %329 = vmatprep.subr.bf16.mxu0 %v328_v24 }
  0x46   :  { %331 = vmatpush3.bf16.msra.mxu0 %v328_v24 }
  0x49   :  { %298 = vmatmul.mubr.f32.vlgmr.msra.gmra.mrb[0].mxu0 %v58_v25 }
 0x11c   :  { %v299_v26 = vpop.f32.mrb[0].mxu0 }
 0x11d   :  { %v141_v28 = vpop.f32.mrb[1].mxu0  ;;  %v169_v29 = vadd.f32 %v299_v26, %v244_v27 }
 0x11e   :  { %v168_v30 = vadd.f32 %v244_v27, %v141_v28 }
 0x11f   :  { %v171_v31 = vmax.f32 %v169_v29, 0.0 }
 0x120   :  { %v170_v32 = vmax.f32 %v168_v30, 0.0 }
 0x122   :  { %v172_v33 = vadd.f32 %v171_v31, %v170_v32 }
 0x124   :  { %v173_v34 = vrot.slane %v172_v33, 4 }
 0x126   :  { %v174_v35 = vadd.f32 %v173_v34, %v172_v33 }
 0x128   :  { %v175_v36 = vrot.slane %v174_v35, 2 }
 0x12a   :  { %v176_v37 = vadd.f32 %v175_v36, %v174_v35 }
 0x12c   :  { %v177_v38 = vrot.slane %v176_v37, 1 }
 0x12e   :  { %v178_v39 = vadd.f32 %v177_v38, %v176_v37 }
 0x130   :  { %v179_v40 = vmul.f32 0.0625, %v178_v39 }
 0x132   :  { %v180_v41 = vsub.f32 %v170_v32, %v179_v40  ;;  %v181_v42 = vsub.f32 %v171_v31, %v179_v40 }
 0x134   :  { %v182_v43 = vmul.f32 %v180_v41, %v180_v41  ;;  %v183_v44 = vmul.f32 %v181_v42, %v181_v42 }
 0x136   :  { %v184_v45 = vadd.f32 %v183_v44, %v182_v43 }
 0x138   :  { %v185_v46 = vrot.slane %v184_v45, 4 }
 0x13a   :  { %v186_v47 = vadd.f32 %v185_v46, %v184_v45 }
 0x13c   :  { %v187_v48 = vrot.slane %v186_v47, 2 }
 0x13e   :  { %v188_v49 = vadd.f32 %v187_v48, %v186_v47 }
 0x140   :  { %v189_v50 = vrot.slane %v188_v49, 1 }
 0x142   :  { %v190_v51 = vadd.f32 %v189_v50, %v188_v49 }
 0x144   :  { %v191_v52 = vmul.f32 0.0625, %v190_v51 }
 0x146   :  { %v192_v53 = vadd.f32 0.001, %v191_v52 }
 0x148   :  { %338 = vrsqrt.f32 %v192_v53 }
 0x152   :  { %v339_v54 = vpop.eup %338 }
 0x153   :  { %v194_v56 = vmul.f32 %v339_v54, %v180_v41  ;;  %v195_v57 = vmul.f32 %v339_v54, %v181_v42 }
 0x155   :  { %v202_v59 = vmul.f32 %v245_v55, %v194_v56  ;;  %v203_v60 = vmul.f32 %v245_v55, %v195_v57 }
 0x157   :  { %v210_v61 = vadd.f32 %v246_v58, %v202_v59  ;;  %v211_v63 = vadd.f32 %v246_v58, %v203_v60 }
 0x159   :  { %v212_v62 = vmul.f32 %v210_v61, %v210_v61  ;;  %v213_v0 = vmul.f32 %v211_v63, %v211_v63 }
 0x15b   :  { %214 = vadd.xlane.f32.xlu0 %v212_v62 }
 0x15f   :  { %216 = vadd.xlane.f32.xlu0 %v213_v0 }
 0x1e8   :  { %v215_v1 = vpop.xlane.xlu0 %214 }
 0x1e9   :  { %v218_v2 = vmax.f32 %v215_v1, 1e-24 }
 0x1eb   :  { %340 = vrsqrt.f32 %v218_v2 }
 0x1ec   :  { %v217_v3 = vpop.xlane.xlu0 %216 }
 0x1ed   :  { %v219_v4 = vmax.f32 %v217_v3, 1e-24 }
 0x1ef   :  { %342 = vrsqrt.f32 %v219_v4 }
 0x1f5   :  { %v341_v5 = vpop.eup %340 }
 0x1f6   :  { %v222_v6 = vmul.f32 %v341_v5, %v210_v61 }
 0x1f8   :  { %224 = vst [vmem:[#allocation7] sm:$0xff] %v222_v6 }
 0x1f9   :  { %v343_v7 = vpop.eup %342 }
 0x1fa   :  { %v223_v8 = vmul.f32 %v343_v7, %v211_v63 }
 0x1fc   :  { %225 = vst [vmem:[#allocation7 + $0x8] sm:$0xff] %v223_v8 }
 0x1fd   :  { %399 = shalt.err (!%p396_p6)
}
 0x1fe   :  { %s400_s25 = scalar_lea.hbm %s510_s5, 256 }
 0x1ff   :  { %p401_p7 = scmp.ne.s32.totalorder %s510_s5, %s400_s25  ;;  %p404_p8 = scmp.lt.u32.totalorder %s400_s25, %s510_s5 }
 0x201   :  { %p406_p9 = pnand %p404_p8, %p401_p7 }
 0x203   :  { %409 = shalt.err (!%p406_p9)
}
 0x204   :  { %237 = dma.vmem_to_hbm [thread:$0]  %s232_s22, 256, %s510_s5, [#allocation4], %s417_s28, %s417_s28, %s418_s29  }
 0x205   :  { %414 = dma.done.wait [#allocation4], 256  }
 0x206   :  { %415 = vsyncadd [#allocation4], 4294967040 }
 0x207   :  { %241 = vsyncpa [#allocation3], 1 }
 0x208   :  { %242 = vsyncpa [#allocation6], 1 }
 0x209   :  { %243 = vsyncpa [#allocation4], 1 }

</bundles_post_ra>
